<compile_context>
chip_gen: v7x
topology: tpu7x:2x2x1
jax: 0.10.0
libtpu: 0.0.40
codegen_flags: <defaults>
</compile_context>

<pallas_src>
import functools
import math

import numpy as np
import jax
import jax.numpy as jnp
from jax.experimental import pallas as pl
from jax.experimental.pallas import tpu as pltpu


def build_pe(d_model: int, max_seq_len: int = 80) -> jnp.ndarray:
    """Deterministic buffer construction, identical to the PyTorch __init__.

    Faithfully 'wrong' like the reference: the cos term uses exponent
    2*(i+1)/d_model and the pe[pos, i+1] write assumes even d_model.
    """
    pe = np.zeros((max_seq_len, d_model), dtype=np.float32)
    for pos in range(max_seq_len):
        for i in range(0, d_model, 2):
            pe[pos, i] = math.sin(pos / 10000 ** (2 * i / d_model))
            pe[pos, i + 1] = math.cos(pos / 10000 ** (2 * (i + 1) / d_model))
    return jnp.asarray(pe)


def prepare_pe_flat(pe: jnp.ndarray, x_shape) -> jnp.ndarray:
    """Hoisted layout plumbing: slice + broadcast + flatten pe ONCE per shape.

    Returns a (1, seq_len*d_model) float32 array, the lane-dense form consumed
    by the kernel.  Faithful to the reference forward: pe[:, :seq_len] is
    broadcast (right-aligned) against x's trailing (seq_len, d_model) axes,
    which only works when d_model == seq_len == max_seq_len — same failure
    mode as the PyTorch original, made legible here.
    """
    seq_len = x_shape[1]
    pe_slice = pe[:, :seq_len]
    try:
        pe_b = jnp.broadcast_to(pe_slice, x_shape[1:])
    except ValueError as e:
        raise ValueError(
            "PositionalEncoder (as written) only broadcasts when "
            "d_model == seq_len == max_seq_len; got pe[:, :seq_len].shape="
            f"{tuple(pe_slice.shape)} vs x trailing shape {tuple(x_shape[1:])}"
        ) from e
    return pe_b.astype(jnp.float32).reshape(1, seq_len * x_shape[2])


def _pos_encoder_kernel(x_ref, pe_ref, o_ref, *, scale):
    # One fused VPU pass per tile: scale the embeddings (in f32, matching the
    # fp32 pe buffer add of the reference) and add the positional row,
    # broadcast over the row (batch) dimension of the tile; cast on the store.
    x = x_ref[...].astype(jnp.float32)
    o_ref[...] = (x * scale + pe_ref[...]).astype(o_ref.dtype)


_PALLAS_MIN_BYTES = 512 * 1024        # below this, launch overhead > any kernel win
_TILE_BYTES_TARGET = 6 * 1024 * 1024  # per-block budget; worst-case footprint
                                      # 2x in + 2x out + 2x pe ≈ 36 MiB < limit below
_VMEM_LIMIT_BYTES = 48 * 1024 * 1024  # explicit scoped-VMEM limit: above the 16/32 MiB
                                      # defaults, safely under v7x's 64 MiB physical VMEM


def _sublane_multiple(dtype) -> int:
    # Rows pack along sublanes for sub-32-bit dtypes: 8 f32, 16 bf16, 32 int8/fp8.
    return max(8, 32 // jnp.dtype(dtype).itemsize)


def positional_encoder(x: jnp.ndarray, pe_flat: jnp.ndarray, d_model: int,
                       *, force_pallas: bool = False) -> jnp.ndarray:
    """Forward pass of PositionalEncoder via a Pallas TPU kernel.

    `pe_flat` is the precomputed (1, seq_len*d_model) float32 buffer from
    prepare_pe_flat() — hoisted out of the per-call path.
    """
    scale = float(math.sqrt(d_model))
    B, S, D = x.shape
    L = S * D
    assert pe_flat.shape == (1, L), (pe_flat.shape, (1, L))

    x_bytes = x.size * x.dtype.itemsize
    if not force_pallas and x_bytes < _PALLAS_MIN_BYTES:
        # Tiny-tensor fast path: a pallas_call launch costs more than this
        # KiB-scale elementwise op; let XLA fuse it (still f32 accumulation).
        out = x.astype(jnp.float32) * scale + pe_flat.reshape(x.shape[1:])
        return out.astype(x.dtype)

    itemsize = x.dtype.itemsize
    sub = _sublane_multiple(x.dtype)
    bytes_per_row = L * itemsize

    # --- joint TB/TL selection against one byte budget -----------------------
    # Prefer full-row blocks (TL = L): fully contiguous HBM streams for x/out,
    # pe resident for the whole kernel.  Only split the lane axis when even a
    # minimal (min(sub,B)-row, L) block would blow the budget.
    if bytes_per_row * min(sub, B) <= _TILE_BYTES_TARGET:
        TL = L
        rows_budget = max(1, _TILE_BYTES_TARGET // bytes_per_row)
        if rows_budget >= B or B < sub:
            TB = B
        else:
            TB = max(sub, (min(rows_budget, B) // sub) * sub)
        # v7x megacore: if everything landed in a single block, split the row
        # axis into >=2 grid steps (when B allows) so both TensorCores get work.
        if TB >= B and B >= 2 * sub:
            TB = ((pl.cdiv(B, 2) + sub - 1) // sub) * sub
    else:
        # A single flattened row is bigger than the budget: tile the lane axis
        # in multiples of 128 and keep a minimal row tile.
        TB = B if B < sub else sub
        TL = max(128, (_TILE_BYTES_TARGET // (TB * itemsize) // 128) * 128)
        TL = min(TL, L)

    # Grid: rows outer, lanes inner (lane axis collapses to 1 step when TL==L).
    grid = (pl.cdiv(B, TB), pl.cdiv(L, TL))

    kernel = functools.partial(_pos_encoder_kernel, scale=scale)

    x_flat = x.reshape(B, L)

    out_flat = pl.pallas_call(
        kernel,
        out_shape=jax.ShapeDtypeStruct((B, L), x.dtype),
        grid_spec=pltpu.PrefetchScalarGridSpec(
            num_scalar_prefetch=0,
            grid=grid,
            in_specs=[
                pl.BlockSpec((TB, TL), lambda i, j: (i, j)),   # x tiles (contiguous when TL==L)
                pl.BlockSpec((1, TL), lambda i, j: (0, j)),    # pe row: resident when TL==L
            ],
            out_specs=pl.BlockSpec((TB, TL), lambda i, j: (i, j)),
        ),
        compiler_params=pltpu.CompilerParams(
            dimension_semantics=("parallel", "parallel"),      # megacore sharding on v7x
            vmem_limit_bytes=_VMEM_LIMIT_BYTES,
        ),
    )(x_flat, pe_flat)

    return out_flat.reshape(x.shape)


if __name__ == "__main__":
    key = jax.random.PRNGKey(0)

    # Small shape consistent with the module's (as-written) broadcast:
    # d_model == seq_len == max_seq_len.
    batch, d_model, seq_len, max_seq_len = 2, 32, 32, 32
    pe = build_pe(d_model, max_seq_len)
    x = jax.random.normal(key, (batch, seq_len, d_model), dtype=jnp.float32)
    pe_flat = prepare_pe_flat(pe, x.shape)   # hoisted, once per shape

    ref = x * math.sqrt(d_model) + pe[:, :seq_len]            # pure-JAX reference

    # 1) Exercise the Pallas kernel (force past the tiny-shape fallback threshold).
    out = positional_encoder(x, pe_flat, d_model, force_pallas=True)
    out = jax.block_until_ready(out)
    np.testing.assert_allclose(np.asarray(out), np.asarray(ref), rtol=1e-6, atol=1e-6)

    # 2) Default dispatch path (tiny tensor -> fused XLA fallback).
    out_fast = positional_encoder(x, pe_flat, d_model)
    out_fast = jax.block_until_ready(out_fast)
    np.testing.assert_allclose(np.asarray(out_fast), np.asarray(ref), rtol=1e-6, atol=1e-6)

    # 3) Slightly larger shape to exercise a multi-step row grid with full-L
    #    contiguous blocks (B=16 -> TB=8 -> 2 grid steps on the parallel axis).
    batch2, d2 = 16, 128
    pe2 = build_pe(d2, d2)
    x2 = jax.random.normal(jax.random.PRNGKey(0), (batch2, d2, d2), dtype=jnp.float32)
    pe2_flat = prepare_pe_flat(pe2, x2.shape)
    ref2 = x2 * math.sqrt(d2) + pe2[:, :d2]
    out2 = positional_encoder(x2, pe2_flat, d2, force_pallas=True)
    out2 = jax.block_until_ready(out2)
    np.testing.assert_allclose(np.asarray(out2), np.asarray(ref2), rtol=1e-6, atol=1e-6)

    print("KERNEL_OK")
</pallas_src>

<mosaic_0001>
module attributes {stable_mosaic.version = 11 : i64} {
  func.func @_pos_encoder_kernel(%arg0: i32, %arg1: i32, %arg2: memref<2x1024xf32, #tpu.memory_space<vmem>>, %arg3: memref<1x1024xf32, #tpu.memory_space<vmem>>, %arg4: memref<2x1024xf32, #tpu.memory_space<vmem>>) attributes {dimension_semantics = [#tpu.dimension_semantics<parallel>, #tpu.dimension_semantics<parallel>], iteration_bounds = array<i64: 1, 1>, scalar_prefetch = 0 : i64, scratch_operands = 0 : i64, tpu.core_type = #tpu.core_type<tc>, window_params = [{transform_indices = @transform_0, window_bounds = array<i64: 2, 1024>}, {transform_indices = @transform_1, window_bounds = array<i64: 1, 1024>}, {transform_indices = @transform_2, window_bounds = array<i64: 2, 1024>}]} {
    %c0 = arith.constant 0 : index
    %c0_0 = arith.constant 0 : index
    %0 = vector.load %arg2[%c0, %c0_0] : memref<2x1024xf32, #tpu.memory_space<vmem>>, vector<2x1024xf32>
    %cst = arith.constant 5.65685415 : f32
    %1 = vector.broadcast %cst : f32 to vector<2x1024xf32>
    %2 = arith.mulf %0, %1 : vector<2x1024xf32>
    %c0_1 = arith.constant 0 : index
    %c0_2 = arith.constant 0 : index
    %3 = vector.load %arg3[%c0_1, %c0_2] : memref<1x1024xf32, #tpu.memory_space<vmem>>, vector<1x1024xf32>
    %4 = vector.broadcast %3 : vector<1x1024xf32> to vector<2x1024xf32>
    %5 = arith.addf %2, %4 : vector<2x1024xf32>
    %c0_3 = arith.constant 0 : index
    %c0_4 = arith.constant 0 : index
    %6 = vector.load %arg4[%c0_3, %c0_4] : memref<2x1024xf32, #tpu.memory_space<vmem>>, vector<2x1024xf32>
    tpu.vector_store %arg4[%c0_3, %c0_4], %5 {strides = array<i32>} : memref<2x1024xf32, #tpu.memory_space<vmem>>, vector<2x1024xf32>,
    return
  }
  func.func @transform_0(%arg0: i32, %arg1: i32) -> (i32, i32) {
    %c0_i32 = arith.constant 0 : i32
    return %arg0, %arg1 : i32, i32
  }
  func.func @transform_1(%arg0: i32, %arg1: i32) -> (i32, i32) {
    %c0_i32 = arith.constant 0 : i32
    %c0_i32_0 = arith.constant 0 : i32
    return %c0_i32, %arg1 : i32, i32
  }
  func.func @transform_2(%arg0: i32, %arg1: i32) -> (i32, i32) {
    %c0_i32 = arith.constant 0 : i32
    return %arg0, %arg1 : i32, i32
  }
}

</mosaic_0001>

<bundles_post_ra>
// kernel: tpu_custom_call.1
= control target key start
LH: loop header
LB: loop body
LE: loop exit
PB: predicated region body
PF: predicated region fallthrough
CT: control target
= control target key end

     0   :  { %7 = vsyncpa [#allocation3], 0  ;;  %s261_s0 = inlined_call_operand.hbm [shape: f32[2,1024], index: 0, kind: input, shape index: {}]   ;;  %s262_s1 = inlined_call_operand.hbm [shape: f32[1,1024], index: 1, kind: input, shape index: {}]   ;;  %s263_s2 = inlined_call_operand.hbm [shape: f32[2,1024], index: 2, kind: output, shape index: {}]  }
   0x1   :  { %8 = vsyncpa [#allocation6], 0 }
   0x2   :  { %9 = vsyncpa [#allocation4], 0  ;;  %s206_s9 = smov [#allocation2]   ;;  %s207_s11 = smov [#allocation5]  }
   0x3   :  { %s16_s10 = sshll.u32 %s206_s9, 4  ;;  %s26_s12 = sshll.u32 %s207_s11, 4  ;;  %s17_s10 = int_to_ptr.vmem [resolvable:$true] %s16_s10  ;;  %s27_s12 = int_to_ptr.vmem [resolvable:$true] %s26_s12 }
   0x4   :  { %s134_s15 = scalar_lea.hbm %s261_s0, 256 }
   0x5   :  { %p135_p0 = scmp.ne.s32.totalorder %s261_s0, %s134_s15  ;;  %p138_p1 = scmp.lt.u32.totalorder %s134_s15, %s261_s0 }
   0x7   :  { %p140_p2 = pnand %p138_p1, %p135_p0 }
   0x9   :  { %143 = shalt.err (!%p140_p2)
}
   0xa   :  { %s144_s20 = scalar_lea.vmem %s17_s10, 256  ;;  %p149_p4 = scmp.lt.s32.totalorder %s17_s10, %s17_s10 }
   0xb   :  { %p145_p3 = scmp.ne.s32.totalorder %s17_s10, %s144_s20  ;;  %p150_p5 = scmp.lt.s32.totalorder %s144_s20, %s144_s20 }
   0xd   :  { %p151_p6 = por %p150_p5, %p149_p4 }
   0xf   :  { %p152_p7 = pnand %p151_p6, %p145_p3 }
  0x11   :  { %155 = shalt.err (!%p152_p7)
}
  0x12   :  { %19 = dma.hbm_to_vmem [thread:$0]  %s261_s0, 256, %s17_s10, [#allocation3]  }
  0x13   :  { %s156_s25 = scalar_lea.hbm %s262_s1, 128 }
  0x14   :  { %p157_p8 = scmp.ne.s32.totalorder %s262_s1, %s156_s25  ;;  %p160_p9 = scmp.lt.u32.totalorder %s156_s25, %s262_s1 }
  0x16   :  { %p162_p10 = pnand %p160_p9, %p157_p8 }
  0x18   :  { %165 = shalt.err (!%p162_p10)
}
  0x19   :  { %s166_s30 = scalar_lea.vmem %s27_s12, 128  ;;  %p171_p12 = scmp.lt.s32.totalorder %s27_s12, %s27_s12 }
  0x1a   :  { %p167_p11 = scmp.ne.s32.totalorder %s27_s12, %s166_s30  ;;  %p172_p13 = scmp.lt.s32.totalorder %s166_s30, %s166_s30 }
  0x1c   :  { %p173_p0 = por %p172_p13, %p171_p12 }
  0x1e   :  { %p174_p1 = pnand %p173_p0, %p167_p11 }
  0x20   :  { %177 = shalt.err (!%p174_p1)
}
  0x21   :  { %29 = dma.hbm_to_vmem [thread:$0]  %s262_s1, 128, %s27_s12, [#allocation6]  }
  0x22   :  { %200 = dma.done.wait [#allocation3], 256  }
  0x23   :  { %201 = vsyncadd [#allocation3], 4294967040 }
  0x24   :  { %202 = dma.done.wait [#allocation6], 128  }
  0x25   :  { %203 = vsyncadd [#allocation6], 4294967168  ;;  %v42_v0 = vlaneseq  ;;  %v208_v1 = vmov 1983009808   ;;  %v40_v13 = vld [vmem:[#allocation5] sm:$0xff]  ;;  %v36_v21 = vld [vmem:[#allocation2] sm:$0xff] }
  0x26   :  { %v77_v2 = vunpack.c.l.s4 %v208_v1  ;;  %v37_v26 = vld [vmem:[#allocation2 + $0x8] sm:$0xff]  ;;  %v38_v30 = vmul.f32 5.656854, %v36_v21  ;;  %s209_s1 = smov [#allocation7]  }
  0x27   :  { %v43_v3 = vshrl.u32 %v42_v0, 7  ;;  %v39_v33 = vmul.f32 5.656854, %v37_v26  ;;  %s120_s4 = sshll.u32 %s209_s1, 4  ;;  %s121_s4 = int_to_ptr.vmem [resolvable:$true] %s120_s4 }
  0x28   :  { %v78_v7 = vunpack.c.0.s8 %v77_v2  ;;  %s178_s5 = scalar_lea.vmem %s121_s4, 256  ;;  %p183_p3 = scmp.lt.s32.totalorder %s121_s4, %s121_s4 }
  0x29   :  { %v44_v4 = vsub.s32 0, %v43_v3  ;;  %v48_v5 = vsub.s32 1, %v43_v3  ;;  %v52_v6 = vsub.s32 2, %v43_v3  ;;  %v56_v8 = vsub.s32 3, %v43_v3  ;;  %p179_p2 = scmp.ne.s32.totalorder %s121_s4, %s178_s5  ;;  %p184_p4 = scmp.lt.s32.totalorder %s178_s5, %s178_s5 }
  0x2a   :  { %v60_v9 = vsub.s32 4, %v43_v3  ;;  %v64_v10 = vsub.s32 5, %v43_v3  ;;  %v68_v11 = vsub.s32 6, %v43_v3  ;;  %v72_v12 = vsub.s32 7, %v43_v3 }
  0x2b   :  { %v45_v14 = vrot.slane %v40_v13, %v44_v4  ;;  %v49_v15 = vrot.slane %v40_v13, %v48_v5  ;;  %v53_v16 = vrot.slane %v40_v13, %v52_v6  ;;  %v81_v17 = vsub.s32 %v78_v7, %v43_v3  ;;  %p185_p5 = por %p184_p4, %p183_p3 }
  0x2c   :  { %v57_v18 = vrot.slane %v40_v13, %v56_v8  ;;  %v61_v19 = vrot.slane %v40_v13, %v60_v9  ;;  %v65_v20 = vrot.slane %v40_v13, %v64_v10  ;;  %v69_v23 = vrot.slane %v40_v13, %v68_v11 }
  0x2d   :  { %v74_v22 = vcombine.low %v45_v14, %v49_v15  ;;  %v73_v24 = vrot.slane %v40_v13, %v72_v12  ;;  %p186_p6 = pnand %p185_p5, %p179_p2 }
  0x2e   :  { %v75_v25 = vcombine.low %v53_v16, %v57_v18  ;;  %v91_v27 = vcombine.low %v61_v19, %v65_v20 }
  0x2f   :  { %v82_v28 = vrot.slane %v74_v22, %v81_v17  ;;  %v92_v29 = vcombine.low %v69_v23, %v73_v24 }
  0x30   :  { %v89_v31 = vrot.slane %v75_v25, %v81_v17  ;;  %v99_v32 = vrot.slane %v91_v27, %v81_v17 }
  0x31   :  { %v106_v34 = vrot.slane %v92_v29, %v81_v17 }
  0x32   :  { %v90_v35 = vcombine.low %v82_v28, %v89_v31 }
  0x33   :  { %v107_v36 = vcombine.low %v99_v32, %v106_v34 }
  0x34   :  { %v110_v37 = vadd.f32 %v90_v35, %v38_v30 }
  0x35   :  { %v111_v38 = vadd.f32 %v107_v36, %v39_v33 }
  0x36   :  { %112 = vst [vmem:[#allocation7] sm:$0xff] %v110_v37 }
  0x37   :  { %113 = vst [vmem:[#allocation7 + $0x8] sm:$0xff] %v111_v38 }
  0x38   :  { %189 = shalt.err (!%p186_p6)
}
  0x39   :  { %s190_s8 = scalar_lea.hbm %s263_s2, 256 }
  0x3a   :  { %p191_p7 = scmp.ne.s32.totalorder %s263_s2, %s190_s8  ;;  %p194_p8 = scmp.lt.u32.totalorder %s190_s8, %s263_s2 }
  0x3c   :  { %p196_p9 = pnand %p194_p8, %p191_p7 }
  0x3e   :  { %199 = shalt.err (!%p196_p9)
}
  0x3f   :  { %123 = dma.vmem_to_hbm [thread:$0]  %s121_s4, 256, %s263_s2, [#allocation4]  }
  0x40   :  { %204 = dma.done.wait [#allocation4], 256  }
  0x41   :  { %205 = vsyncadd [#allocation4], 4294967040 }
  0x42   :  { %127 = vsyncpa [#allocation3], 1 }
  0x43   :  { %128 = vsyncpa [#allocation6], 1 }
  0x44   :  { %129 = vsyncpa [#allocation4], 1 }

</bundles_post_ra>
